<compile_context>
chip_gen: v5e
topology: v5e:2x2
jax: 0.10.0
libtpu: 0.0.40
codegen_flags: <defaults>
</compile_context>

<pallas_src>
import jax
import jax.numpy as jnp
from jax.experimental import pallas as pl
from jax.experimental.pallas import tpu as pltpu

EMBED_DIM = 32            # embed_dim of the reference model
HID2 = 16                 # w_uv2 output width
BN_EPS = 1e-5

# ---- bf16 weight slab layout, shape (64, WSLAB_W) ---------------------------
# Every block starts at a lane offset that is a multiple of 128.
WSLAB_W = 384
L_W1 = 0      # [:,     0: 64]  W1^T  = blockdiag(w_ur1*bn1, w_vr1*bn2)^T  (64, 64)
L_W23 = 128   # [:32, 128:192]  W23^T = (w_uv1*bn3)^T @ blockdiag(w_*r2)^T (32, 64)
L_W4 = 256    # [:16, 256:288]  W4^T  = (w_uv2*bn4)^T                       (16, 32)

# ---- f32 bias slab layout, shape (64, BSLAB_W) -------------------------------
BSLAB_W = 128
C_B1 = 0      # [:,   0]  folded b_ur1 || b_vr1     (64,)
C_B23 = 1     # [:32, 1]  folded b23                (32,)
C_B4 = 2      # [:16, 2]  folded b_uv2              (16,)
C_W5 = 3      # [:16, 3]  w_uv3 column              (16,)
C_B5 = 4      # [0,   4]  b_uv3 scalar


def _round_up(x, m):
    return ((x + m - 1) // m) * m


# ----------------------------- kernel ----------------------------------------
def graphrec_kernel(w_ref, b_ref, u_ref, v_ref, out_ref):
    # u_ref / v_ref: (TB, 32) bf16 batch tiles (batch on sublanes).
    # Transpose to feature-major (32, TB) in-kernel (XLU has slack under the
    # MXU-bound regime); done in f32 for robust lowering, then cast to bf16.
    xu = u_ref[...].astype(jnp.float32).T                      # (32, TB)
    xv = v_ref[...].astype(jnp.float32).T                      # (32, TB)
    x = jnp.concatenate([xu, xv], axis=0).astype(jnp.bfloat16)  # (64, TB) bf16

    # Lane-aligned weight views (bf16) and f32 biases.
    w1t = w_ref[:, L_W1:L_W1 + 64]                    # (64, 64)
    w23t = w_ref[0:EMBED_DIM, L_W23:L_W23 + 64]       # (32, 64)
    w4t = w_ref[0:HID2, L_W4:L_W4 + 32]               # (16, 32)

    b1 = b_ref[:, C_B1:C_B1 + 1]                      # (64, 1)
    b23 = b_ref[0:EMBED_DIM, C_B23:C_B23 + 1]         # (32, 1)
    b4 = b_ref[0:HID2, C_B4:C_B4 + 1]                 # (16, 1)
    w5 = b_ref[0:HID2, C_W5:C_W5 + 1]                 # (16, 1)
    b5 = b_ref[0:1, C_B5:C_B5 + 1]                    # (1, 1)

    # Fused user+item towers (BN1/BN2 folded, eval dropout = identity):
    #   h = relu([w_ur1 | w_vr1](e))                          -> (64, TB)
    h = jnp.maximum(
        jnp.dot(w1t, x, preferred_element_type=jnp.float32) + b1, 0.0)

    # w_ur2/w_vr2 folded into w_uv1 (+BN3): one (32, 64) matmul instead of two.
    z = jnp.maximum(
        jnp.dot(w23t, h.astype(jnp.bfloat16),
                preferred_element_type=jnp.float32) + b23, 0.0)            # (32, TB)
    z2 = jnp.maximum(
        jnp.dot(w4t, z.astype(jnp.bfloat16),
                preferred_element_type=jnp.float32) + b4, 0.0)             # (16, TB)

    # Final 16 -> 1 linear as VPU multiply + sublane (XLU) reduce; output stays
    # lane-dense (1, TB).
    out_ref[...] = jnp.sum(z2 * w5, axis=0, keepdims=True) + b5


# ----------------------------- wrapper ----------------------------------------
def graphrec_forward(embeds_u, embeds_v, packed_params, *, tb=2048):
    """embeds_u/embeds_v: (B, EMBED_DIM).  Returns scores of shape (B,)."""
    w_slab, b_slab = packed_params
    B = embeds_u.shape[0]
    tb = min(tb, _round_up(B, 128))          # lane-dense tile, multiple of 128
    b_pad = _round_up(B, tb)

    # Stream the embeddings in bf16 (halves the dominant HBM traffic); only a
    # tail zero-pad remains (no concat / transpose pass in the wrapper).
    u = embeds_u.astype(jnp.bfloat16)
    v = embeds_v.astype(jnp.bfloat16)
    if b_pad != B:
        u = jnp.pad(u, ((0, b_pad - B), (0, 0)))
        v = jnp.pad(v, ((0, b_pad - B), (0, 0)))

    grid = (b_pad // tb,)
    # TODO(synk): on v7x, pltpu.CORE_PARALLEL on this axis would split the batch
    # across the two TensorCores; kept "parallel" here for portability.
    out = pl.pallas_call(
        graphrec_kernel,
        out_shape=jax.ShapeDtypeStruct((1, b_pad), jnp.float32),
        grid=grid,
        in_specs=[
            # parameter slabs: constant block index -> DMA'd once, stay resident
            pl.BlockSpec((2 * EMBED_DIM, WSLAB_W), lambda i: (0, 0)),
            pl.BlockSpec((2 * EMBED_DIM, BSLAB_W), lambda i: (0, 0)),
            # embeddings: one (TB, 32) batch tile each per grid step (pipelined)
            pl.BlockSpec((tb, EMBED_DIM), lambda i: (i, 0)),
            pl.BlockSpec((tb, EMBED_DIM), lambda i: (i, 0)),
        ],
        out_specs=pl.BlockSpec((1, tb), lambda i: (0, i)),
        compiler_params=pltpu.CompilerParams(
            dimension_semantics=("parallel",),
            vmem_limit_bytes=32 * 1024 * 1024,
        ),
    )(w_slab, b_slab, u, v)
    return out[0, :B]                         # matches scores.squeeze()


# ------------------------- host-side parameter prep ---------------------------
def _fold_bn(w, b, bn):
    # Eval-mode BN folded into preceding Linear: y = bn(x@W + b)
    gamma, beta, mean, var = bn[0], bn[1], bn[2], bn[3]
    s = gamma * jax.lax.rsqrt(var + BN_EPS)
    return w * s[None, :], (b - mean) * s + beta


def _blockdiag(a, b):
    a0, a1 = a.shape
    b0, b1 = b.shape
    top = jnp.concatenate([a, jnp.zeros((a0, b1), a.dtype)], axis=1)
    bot = jnp.concatenate([jnp.zeros((b0, a1), b.dtype), b], axis=1)
    return jnp.concatenate([top, bot], axis=0)


def pack_params(p):
    """Fold eval BN into Linears, fuse towers, fold W2 into W3, pack slabs."""
    w_ur1, b_ur1 = _fold_bn(p["w_ur1"], p["b_ur1"], p["bn1"])
    w_vr1, b_vr1 = _fold_bn(p["w_vr1"], p["b_vr1"], p["bn2"])
    w_uv1, b_uv1 = _fold_bn(p["w_uv1"], p["b_uv1"], p["bn3"])
    w_uv2, b_uv2 = _fold_bn(p["w_uv2"], p["b_uv2"], p["bn4"])

    w1t = _blockdiag(w_ur1, w_vr1).T                     # (64, 64)
    w2t = _blockdiag(p["w_ur2"], p["w_vr2"]).T           # (64, 64)
    w3t = w_uv1.T                                        # (32, 64)

    # Exact fold of w_*r2 into w_uv1 (no nonlinearity between them).
    w23t = w3t @ w2t                                     # (32, 64)
    b2 = jnp.concatenate([p["b_ur2"], p["b_vr2"]])       # (64,)
    b23 = w3t @ b2 + b_uv1                               # (32,)
    w4t = w_uv2.T                                        # (16, 32)

    w_slab = jnp.zeros((2 * EMBED_DIM, WSLAB_W), jnp.float32)
    w_slab = w_slab.at[:, L_W1:L_W1 + 64].set(w1t)
    w_slab = w_slab.at[:EMBED_DIM, L_W23:L_W23 + 64].set(w23t)
    w_slab = w_slab.at[:HID2, L_W4:L_W4 + 32].set(w4t)
    w_slab = w_slab.astype(jnp.bfloat16)

    b_slab = jnp.zeros((2 * EMBED_DIM, BSLAB_W), jnp.float32)
    b_slab = b_slab.at[:, C_B1].set(jnp.concatenate([b_ur1, b_vr1]))
    b_slab = b_slab.at[:EMBED_DIM, C_B23].set(b23)
    b_slab = b_slab.at[:HID2, C_B4].set(b_uv2)
    b_slab = b_slab.at[:HID2, C_W5].set(p["w_uv3"][:, 0])
    b_slab = b_slab.at[0, C_B5].set(p["b_uv3"][0])
    return w_slab, b_slab


def _linear_init(key, fan_in, fan_out):
    # PyTorch nn.Linear default: U(-1/sqrt(fan_in), 1/sqrt(fan_in))
    kw, kb = jax.random.split(key)
    bound = 1.0 / (fan_in ** 0.5)
    w = jax.random.uniform(kw, (fan_in, fan_out), jnp.float32, -bound, bound)
    b = jax.random.uniform(kb, (fan_out,), jnp.float32, -bound, bound)
    return w, b


def _bn_init(dim):
    # rows: gamma, beta, running_mean, running_var
    return jnp.concatenate(
        [jnp.ones((1, dim), jnp.float32),
         jnp.zeros((1, dim), jnp.float32),
         jnp.zeros((1, dim), jnp.float32),
         jnp.ones((1, dim), jnp.float32)], axis=0)


def make_params(key):
    D = EMBED_DIM
    keys = jax.random.split(key, 7)
    p = {}
    p["w_ur1"], p["b_ur1"] = _linear_init(keys[0], D, D)
    p["w_ur2"], p["b_ur2"] = _linear_init(keys[1], D, D)
    p["w_vr1"], p["b_vr1"] = _linear_init(keys[2], D, D)
    p["w_vr2"], p["b_vr2"] = _linear_init(keys[3], D, D)
    p["w_uv1"], p["b_uv1"] = _linear_init(keys[4], 2 * D, D)
    p["w_uv2"], p["b_uv2"] = _linear_init(keys[5], D, HID2)
    p["w_uv3"], p["b_uv3"] = _linear_init(keys[6], HID2, 1)
    p["bn1"] = _bn_init(D)
    p["bn2"] = _bn_init(D)
    p["bn3"] = _bn_init(D)
    p["bn4"] = _bn_init(HID2)
    return p


# ------------------------- pure-JAX reference (unfused, f32) ------------------
def graphrec_reference(embeds_u, embeds_v, p):
    def bn(x, b):
        gamma, beta, mean, var = b[0], b[1], b[2], b[3]
        return gamma * (x - mean) * jax.lax.rsqrt(var + BN_EPS) + beta
    x_u = jnp.maximum(bn(embeds_u @ p["w_ur1"] + p["b_ur1"], p["bn1"]), 0.0)
    x_u = x_u @ p["w_ur2"] + p["b_ur2"]
    x_v = jnp.maximum(bn(embeds_v @ p["w_vr1"] + p["b_vr1"], p["bn2"]), 0.0)
    x_v = x_v @ p["w_vr2"] + p["b_vr2"]
    x_uv = jnp.concatenate([x_u, x_v], axis=1)
    x = jnp.maximum(bn(x_uv @ p["w_uv1"] + p["b_uv1"], p["bn3"]), 0.0)
    x = jnp.maximum(bn(x @ p["w_uv2"] + p["b_uv2"], p["bn4"]), 0.0)
    scores = x @ p["w_uv3"] + p["b_uv3"]
    return jnp.squeeze(scores, axis=-1)


if __name__ == "__main__":
    key = jax.random.PRNGKey(0)
    k_params, k_u_tab, k_v_tab = jax.random.split(key, 3)

    B = 8
    NUM_USERS, NUM_ITEMS = 64, 64

    params = make_params(k_params)
    packed = pack_params(params)      # one-time host-side BN fold + W2W3 fold + pack

    # enc_u / enc_v_history stand-ins: simple embedding tables (JAX glue).
    # TODO(synk): the real enc_u / enc_v_history are graph aggregators; modeled as lookups here.
    user_table = jax.random.normal(k_u_tab, (NUM_USERS, EMBED_DIM), jnp.float32)
    item_table = jax.random.normal(k_v_tab, (NUM_ITEMS, EMBED_DIM), jnp.float32)

    nodes_u = jnp.arange(B, dtype=jnp.int32)
    nodes_v = (jnp.arange(B, dtype=jnp.int32) * 3) % NUM_ITEMS

    embeds_u = user_table[nodes_u]
    embeds_v = item_table[nodes_v]

    scores = graphrec_forward(embeds_u, embeds_v, packed)
    scores = jax.block_until_ready(scores)
    assert scores.shape == (B,)

    ref = graphrec_reference(embeds_u, embeds_v, params)
    # bf16 MXU path => ~1e-2 level deviations vs the f32 reference.
    assert jnp.allclose(scores, ref, atol=5e-2, rtol=5e-2), (scores, ref)
    print("KERNEL_OK")
</pallas_src>

<mosaic_0001>
module attributes {stable_mosaic.version = 11 : i64} {
  func.func @graphrec_kernel(%arg0: i32, %arg1: memref<64x384xbf16, #tpu.memory_space<vmem>>, %arg2: memref<64x128xf32, #tpu.memory_space<vmem>>, %arg3: memref<128x32xbf16, #tpu.memory_space<vmem>>, %arg4: memref<128x32xbf16, #tpu.memory_space<vmem>>, %arg5: memref<1x128xf32, #tpu.memory_space<vmem>>) attributes {dimension_semantics = [#tpu.dimension_semantics<parallel>], iteration_bounds = array<i64: 1>, scalar_prefetch = 0 : i64, scratch_operands = 0 : i64, tpu.core_type = #tpu.core_type<tc>, window_params = [{pipeline_mode = #tpu.pipeline_mode<synchronous>, transform_indices = @transform_0, window_bounds = array<i64: 64, 384>}, {pipeline_mode = #tpu.pipeline_mode<synchronous>, transform_indices = @transform_1, window_bounds = array<i64: 64, 128>}, {transform_indices = @transform_2, window_bounds = array<i64: 128, 32>}, {transform_indices = @transform_3, window_bounds = array<i64: 128, 32>}, {transform_indices = @transform_4, window_bounds = array<i64: 1, 128>}]} {
    %c0 = arith.constant 0 : index
    %c0_0 = arith.constant 0 : index
    %0 = vector.load %arg3[%c0, %c0_0] : memref<128x32xbf16, #tpu.memory_space<vmem>>, vector<128x32xbf16>
    %1 = arith.extf %0 : vector<128x32xbf16> to vector<128x32xf32>
    %2 = tpu.transpose %1, [1, 0] : vector<128x32xf32> -> vector<32x128xf32>
    %c0_1 = arith.constant 0 : index
    %c0_2 = arith.constant 0 : index
    %3 = vector.load %arg4[%c0_1, %c0_2] : memref<128x32xbf16, #tpu.memory_space<vmem>>, vector<128x32xbf16>
    %4 = arith.extf %3 : vector<128x32xbf16> to vector<128x32xf32>
    %5 = tpu.transpose %4, [1, 0] : vector<128x32xf32> -> vector<32x128xf32>
    %6 = tpu.concatenate %2, %5 in 0 : vector<32x128xf32>, vector<32x128xf32> -> vector<64x128xf32>
    %7 = arith.truncf %6 : vector<64x128xf32> to vector<64x128xbf16>
    %c0_3 = arith.constant 0 : index
    %c0_4 = arith.constant 0 : index
    %8 = vector.load %arg1[%c0_3, %c0_4] : memref<64x384xbf16, #tpu.memory_space<vmem>>, vector<64x64xbf16>
    %c0_5 = arith.constant 0 : index
    %c128 = arith.constant 128 : index
    %9 = vector.load %arg1[%c0_5, %c128] : memref<64x384xbf16, #tpu.memory_space<vmem>>, vector<32x64xbf16>
    %c0_6 = arith.constant 0 : index
    %c256 = arith.constant 256 : index
    %10 = vector.load %arg1[%c0_6, %c256] : memref<64x384xbf16, #tpu.memory_space<vmem>>, vector<16x32xbf16>
    %c0_7 = arith.constant 0 : index
    %c0_8 = arith.constant 0 : index
    %11 = vector.load %arg2[%c0_7, %c0_8] : memref<64x128xf32, #tpu.memory_space<vmem>>, vector<64x1xf32>
    %c0_9 = arith.constant 0 : index
    %c1 = arith.constant 1 : index
    %12 = vector.load %arg2[%c0_9, %c1] : memref<64x128xf32, #tpu.memory_space<vmem>>, vector<32x1xf32>
    %c0_10 = arith.constant 0 : index
    %c2 = arith.constant 2 : index
    %13 = vector.load %arg2[%c0_10, %c2] : memref<64x128xf32, #tpu.memory_space<vmem>>, vector<16x1xf32>
    %c0_11 = arith.constant 0 : index
    %c3 = arith.constant 3 : index
    %14 = vector.load %arg2[%c0_11, %c3] : memref<64x128xf32, #tpu.memory_space<vmem>>, vector<16x1xf32>
    %c0_12 = arith.constant 0 : index
    %c4 = arith.constant 4 : index
    %15 = vector.load %arg2[%c0_12, %c4] : memref<64x128xf32, #tpu.memory_space<vmem>>, vector<1x1xf32>
    %cst = arith.constant dense<0.000000e+00> : vector<64x128xf32>
    %16 = tpu.matmul %8, %7, %cst {dimension_numbers = #tpu.dot_dimension_numbers<[1], [0], [0], [1], [0, 0, 1, 1], [], []>} : vector<64x64xbf16>, vector<64x128xbf16>, vector<64x128xf32> -> vector<64x128xf32>
    %17 = vector.broadcast %11 : vector<64x1xf32> to vector<64x128xf32>
    %18 = arith.addf %16, %17 : vector<64x128xf32>
    %cst_13 = arith.constant 0.000000e+00 : f32
    %19 = vector.broadcast %cst_13 : f32 to vector<64x128xf32>
    %20 = arith.maximumf %18, %19 : vector<64x128xf32>
    %21 = arith.truncf %20 : vector<64x128xf32> to vector<64x128xbf16>
    %cst_14 = arith.constant dense<0.000000e+00> : vector<32x128xf32>
    %22 = tpu.matmul %9, %21, %cst_14 {dimension_numbers = #tpu.dot_dimension_numbers<[1], [0], [0], [1], [0, 0, 1, 1], [], []>} : vector<32x64xbf16>, vector<64x128xbf16>, vector<32x128xf32> -> vector<32x128xf32>
    %23 = vector.broadcast %12 : vector<32x1xf32> to vector<32x128xf32>
    %24 = arith.addf %22, %23 : vector<32x128xf32>
    %cst_15 = arith.constant 0.000000e+00 : f32
    %25 = vector.broadcast %cst_15 : f32 to vector<32x128xf32>
    %26 = arith.maximumf %24, %25 : vector<32x128xf32>
    %27 = arith.truncf %26 : vector<32x128xf32> to vector<32x128xbf16>
    %cst_16 = arith.constant dense<0.000000e+00> : vector<16x128xf32>
    %28 = tpu.matmul %10, %27, %cst_16 {dimension_numbers = #tpu.dot_dimension_numbers<[1], [0], [0], [1], [0, 0, 1, 1], [], []>} : vector<16x32xbf16>, vector<32x128xbf16>, vector<16x128xf32> -> vector<16x128xf32>
    %29 = vector.broadcast %13 : vector<16x1xf32> to vector<16x128xf32>
    %30 = arith.addf %28, %29 : vector<16x128xf32>
    %cst_17 = arith.constant 0.000000e+00 : f32
    %31 = vector.broadcast %cst_17 : f32 to vector<16x128xf32>
    %32 = arith.maximumf %30, %31 : vector<16x128xf32>
    %33 = vector.broadcast %14 : vector<16x1xf32> to vector<16x128xf32>
    %34 = arith.mulf %32, %33 : vector<16x128xf32>
    %cst_18 = arith.constant dense<0.000000e+00> : vector<128xf32>
    %35 = vector.multi_reduction <add>, %34, %cst_18 [0] : vector<16x128xf32> to vector<128xf32>
    %36 = vector.shape_cast %35 : vector<128xf32> to vector<1x128xf32>
    %37 = vector.broadcast %15 : vector<1x1xf32> to vector<1x128xf32>
    %38 = arith.addf %36, %37 : vector<1x128xf32>
    %c0_19 = arith.constant 0 : index
    %c0_20 = arith.constant 0 : index
    %39 = vector.load %arg5[%c0_19, %c0_20] : memref<1x128xf32, #tpu.memory_space<vmem>>, vector<1x128xf32>
    tpu.vector_store %arg5[%c0_19, %c0_20], %38 {strides = array<i32>} : memref<1x128xf32, #tpu.memory_space<vmem>>, vector<1x128xf32>,
    return
  }
  func.func @transform_0(%arg0: i32) -> (i32, i32) {
    %c0_i32 = arith.constant 0 : i32
    %c0_i32_0 = arith.constant 0 : i32
    %c0_i32_1 = arith.constant 0 : i32
    return %c0_i32, %c0_i32_0 : i32, i32
  }
  func.func @transform_1(%arg0: i32) -> (i32, i32) {
    %c0_i32 = arith.constant 0 : i32
    %c0_i32_0 = arith.constant 0 : i32
    %c0_i32_1 = arith.constant 0 : i32
    return %c0_i32, %c0_i32_0 : i32, i32
  }
  func.func @transform_2(%arg0: i32) -> (i32, i32) {
    %c0_i32 = arith.constant 0 : i32
    %c0_i32_0 = arith.constant 0 : i32
    return %arg0, %c0_i32 : i32, i32
  }
  func.func @transform_3(%arg0: i32) -> (i32, i32) {
    %c0_i32 = arith.constant 0 : i32
    %c0_i32_0 = arith.constant 0 : i32
    return %arg0, %c0_i32 : i32, i32
  }
  func.func @transform_4(%arg0: i32) -> (i32, i32) {
    %c0_i32 = arith.constant 0 : i32
    %c0_i32_0 = arith.constant 0 : i32
    return %c0_i32, %arg0 : i32, i32
  }
}

</mosaic_0001>

<bundles_post_ra>
// kernel: tpu_custom_call.1
= control target key start
LH: loop header
LB: loop body
LE: loop exit
PB: predicated region body
PF: predicated region fallthrough
CT: control target
= control target key end

     0   :  { %9 = vsyncpa [#allocation3], 0  ;;  %s806_s0 = inlined_call_operand.vmem [shape: bf16[64,384], index: 0, kind: input, shape index: {}]   ;;  %s807_s1 = inlined_call_operand.hbm [shape: f32[64,128], index: 1, kind: input, shape index: {}]   ;;  %s808_s2 = inlined_call_operand.vmem [shape: bf16[128,32], index: 2, kind: input, shape index: {}]   ;;  %s809_s3 = inlined_call_operand.vmem [shape: bf16[128,32], index: 3, kind: input, shape index: {}]   ;;  %s810_s4 = inlined_call_operand.hbm [shape: f32[1,128], index: 4, kind: output, shape index: {}]  }
   0x1   :  { %10 = vsyncpa [#allocation4], 0  ;;  %s17_s17 = sshll.u32 %s807_s1, 4  ;;  %s658_s18 = smov [#allocation2]   ;;  %s18_s17 = int_to_ptr.hbm [resolvable:$true] %s17_s17 }
   0x2   :  { %s19_s19 = sshll.u32 %s658_s18, 4  ;;  %s659_s20 = smov 128   ;;  %s20_s19 = int_to_ptr.vmem [resolvable:$true] %s19_s19 }
   0x3   :  { %s660_s21 = smov 8  }
   0x4   :  { %25 = dma.hbm_to_vmem [thread:$0]  %s18_s17, 1024, %s20_s19, [#allocation3], %s659_s20, %s659_s20, %s660_s21  }
   0x5   :  { %654 = dma.done.wait [#allocation3], 1024  }
   0x6   :  { %655 = vsyncadd [#allocation3], 4294966272  ;;  %v486_v0 = vld [vmem:[%s808_s2] sm:$0xff]   ;;  %v549_v2 = vld [vmem:[%s808_s2 + $0x8] sm:$0xff]   ;;  %v661_v17 = vmov 0   ;;  %vm254_vm0 = vcmask 523264  }
   0x7   :  { %v518_v1 = vld [vmem:[%s809_s3] sm:$0xff]   ;;  %v556_v3 = vld [vmem:[%s809_s3 + $0x8] sm:$0xff]   ;;  %v550_v4 = vld [vmem:[%s808_s2 + $0x10] sm:$0xff]   ;;  %596 = vset.pattern.permute.xlu1 %v661_v17  ;;  %597 = vset.pattern.permute.xlu2 %v661_v17  ;;  %v662_v49 = vmov 1   ;;  %vm382_vm1 = vcmask 261120   ;;  %s433_s1 = sshll.u32 %s810_s4, 4  ;;  %s434_s1 = int_to_ptr.hbm [resolvable:$true] %s433_s1 }
   0x8   :  { %576 = vxpose.binary.xlu0.c.b16.start [1/16] (narrow) %v486_v0, %v518_v1, 32  ;;  %v557_v5 = vld [vmem:[%s809_s3 + $0x10] sm:$0xff]   ;;  %v551_v6 = vld [vmem:[%s808_s2 + $0x18] sm:$0xff]   ;;  %v552_v8 = vld [vmem:[%s808_s2 + $0x20] sm:$0xff]  }
   0x9   :  { %v558_v7 = vld [vmem:[%s809_s3 + $0x18] sm:$0xff]   ;;  %v559_v9 = vld [vmem:[%s809_s3 + $0x20] sm:$0xff]   ;;  %v553_v10 = vld [vmem:[%s808_s2 + $0x28] sm:$0xff]  }
   0xa   :  { %v560_v11 = vld [vmem:[%s809_s3 + $0x28] sm:$0xff]   ;;  %v554_v12 = vld [vmem:[%s808_s2 + $0x30] sm:$0xff]   ;;  %v555_v14 = vld [vmem:[%s808_s2 + $0x38] sm:$0xff]  }
   0xb   :  { %v561_v13 = vld [vmem:[%s809_s3 + $0x30] sm:$0xff]   ;;  %v562_v15 = vld [vmem:[%s809_s3 + $0x38] sm:$0xff]   ;;  %v185_v23 = vld [vmem:[#allocation2 + $0x20] sm:$0xff] }
   0xc   :  { %v187_v18 = vld [vmem:[#allocation2 + $0x30] sm:$0xff]  ;;  %v188_v20 = vld [vmem:[#allocation2 + $0x38] sm:$0xff]  ;;  %216 = vperm.xlu2 %597, %v185_v23   ;;  %v743_v25 = vld [vmem:[#allocation2] sm:$0xff]  ;;  %v664_v23 = vmov 4  }
   0xd   :  { %226 = vperm.xlu1 %596, %v187_v18   ;;  %v183_v22 = vld [vmem:[#allocation2 + $0x10] sm:$0xff]  ;;  %v186_v26 = vld [vmem:[#allocation2 + $0x28] sm:$0xff]  ;;  %v445_v27 = vld [vmem:[%s806_s0] sm:$0xf] }
   0xe   :  { %v478_v28 = vld [vmem:[%s806_s0 + $0x8] sm:$0xf0]  ;;  %v453_v29 = vld [vmem:[%s806_s0 + $0x30] sm:$0xf]  ;;  %v480_v30 = vld [vmem:[%s806_s0 + $0x38] sm:$0xf0] }
   0xf   :  { %v446_v31 = vor.u32 %v478_v28, %v445_v27  ;;  %v454_v32 = vor.u32 %v480_v30, %v453_v29  ;;  %v184_v33 = vld [vmem:[#allocation2 + $0x18] sm:$0xff]  ;;  %v760_v34 = vld [vmem:[#allocation2 + $0x8] sm:$0xff]  ;;  %v479_v36 = vld [vmem:[%s806_s0 + $0x20] sm:$0xf0]  ;;  %v665_v28 = vmov 3  }
  0x10   :  { %v449_v35 = vld [vmem:[%s806_s0 + $0x18] sm:$0xf]  ;;  %v457_v37 = vld [vmem:[%s806_s0 + $0x48] sm:$0xf]  ;;  %v481_v38 = vld [vmem:[%s806_s0 + $0x50] sm:$0xf0] }
  0x11   :  { %v450_v39 = vor.u32 %v479_v36, %v449_v35  ;;  %v458_v40 = vor.u32 %v481_v38, %v457_v37  ;;  %v469_v17 = vld [vmem:[%s806_s0 + $0x1c] sm:$0xf]  ;;  %v483_v18 = vld [vmem:[%s806_s0 + $0x24] sm:$0xf0] }
  0x14   :  { %221 = vperm.xlu2 %597, %v186_v26  }
  0x15   :  { %231 = vperm.xlu1 %596, %v188_v20  }
  0x18   :  { %577 = vxpose.binary.xlu0.c.b16.cont [2/16] (narrow) %v549_v2, %v556_v3, 32 }
  0x1c   :  { %211 = vperm.xlu2 %597, %v184_v33  }
  0x1d   :  { %206 = vperm.xlu1 %596, %v183_v22  }
  0x24   :  { %201 = vperm.xlu2 %597, %v760_v34  }
  0x25   :  { %196 = vperm.xlu1 %596, %v743_v25  }
  0x28   :  { %578 = vxpose.binary.xlu0.c.b16.cont [3/16] (narrow) %v550_v4, %v557_v5, 32 }
  0x2c   :  { %599 = vset.pattern.permute.xlu2 %v662_v49 }
  0x2d   :  { %598 = vset.pattern.permute.xlu1 %v662_v49  ;;  %325 = vperm.xlu2 %599, %v184_v33  }
  0x2e   :  { %320 = vperm.xlu1 %598, %v183_v22  }
  0x35   :  { %315 = vperm.xlu2 %599, %v760_v34  }
  0x36   :  { %310 = vperm.xlu1 %598, %v743_v25  }
  0x38   :  { %579 = vxpose.binary.xlu0.c.b16.cont [4/16] (narrow) %v551_v6, %v558_v7, 32 }
  0x48   :  { %580 = vxpose.binary.xlu0.c.b16.cont [5/16] (narrow) %v552_v8, %v559_v9, 32 }
  0x58   :  { %581 = vxpose.binary.xlu0.c.b16.cont [6/16] (narrow) %v553_v10, %v560_v11, 32 }
  0x66   :  { %v217_v42 = vpop.permute.xlu2 %216 }
  0x68   :  { %582 = vxpose.binary.xlu0.c.b16.cont [7/16] (narrow) %v554_v12, %v561_v13, 32  ;;  %v465_v13 = vld [vmem:[%s806_s0 + $0x4] sm:$0xf] }
  0x6e   :  { %v222_v48 = vpop.permute.xlu2 %221 }
  0x76   :  { %v212_v52 = vpop.permute.xlu2 %211 }
  0x78   :  { %583 = vxpose.binary.xlu0.c.b16.end [8/16] (narrow) %v555_v14, %v562_v15, 32  ;;  %v482_v14 = vld [vmem:[%s806_s0 + $0xc] sm:$0xf0] }
  0x7e   :  { %v202_v1 = vpop.permute.xlu2 %201 }
  0x7f   :  { %v227_v43 = vpop.permute.xlu1 %226 }
  0x87   :  { %v232_v47 = vpop.permute.xlu1 %231 }
  0x8f   :  { %v207_v53 = vpop.permute.xlu1 %206 }
  0x97   :  { %v197_v2 = vpop.permute.xlu1 %196 }
  0xa0   :  { %v321_v26 = vpop.permute.xlu1 %320 }
  0xb4   :  { %v584_v16 = vpop.trf.xlu0 }
  0xbc   :  { %v585_v19 = vpop.trf.xlu0 }
  0xc4   :  { %v590_v21 = vpop.trf.xlu0 }
  0xc5   :  { %271 = vmatpush.bf16.msra.mxu0 %v590_v21  ;;  %563 = vmatpush.bf16.msra.mxu3 %v590_v21  ;;  %v663_v21 = vmov 2  }
  0xc6   :  { %600 = vset.pattern.permute.xlu1 %v663_v21  ;;  %601 = vset.pattern.permute.xlu2 %v663_v21 }
  0xc7   :  { %370 = vperm.xlu1 %600, %v743_v25   ;;  %374 = vperm.xlu2 %601, %v760_v34  }
  0xc9   :  { %272 = vmatpush.bf16.msra.mxu0 %v584_v16  ;;  %564 = vmatpush.bf16.msra.mxu3 %v584_v16  ;;  %v466_v16 = vor.u32 %v482_v14, %v465_v13 }
  0xcc   :  { %v591_v24 = vpop.trf.xlu0 }
  0xcd   :  { %273 = vmatpush.bf16.msra.mxu0 %v591_v24  ;;  %565 = vmatpush.bf16.msra.mxu3 %v591_v24  ;;  %v326_v24 = vpop.permute.xlu2 %325 }
  0xcf   :  { %602 = vset.pattern.permute.xlu1 %v665_v28  ;;  %603 = vset.pattern.permute.xlu2 %v665_v28 }
  0xd0   :  { %403 = vperm.xlu1 %602, %v743_v25   ;;  %407 = vperm.xlu2 %603, %v760_v34   ;;  %v475_v25 = vld [vmem:[%s806_s0 + $0x8] sm:$0xf]  ;;  %v484_v34 = vld [vmem:[%s806_s0 + $0x10] sm:$0xf0]  ;;  %s666_s0 = smov [#allocation5]  }
  0xd1   :  { %274 = vmatpush.bf16.msra.mxu0 %v585_v19  ;;  %566 = vmatpush.bf16.msra.mxu3 %v585_v19  ;;  %v470_v19 = vor.u32 %v483_v18, %v469_v17  ;;  %s431_s26 = sshll.u32 %s666_s0, 4  ;;  %s432_s26 = int_to_ptr.vmem [resolvable:$true] %s431_s26 }
  0xd4   :  { %459 = vmatmul.msk.bf16.vlgmr.msra.gmra.mxu0 %vm254_vm0, %v446_v31  ;;  %461 = vmatmul.msk.bf16.vlgmr.msra.gmra.mxu3 %vm254_vm0, %v454_v32  ;;  %v193_v31 = vld [vmem:[#allocation2] sm:$0x1]  ;;  %v311_v32 = vpop.permute.xlu1 %310 }
  0xd5   :  { %v316_v29 = vpop.permute.xlu2 %315 }
  0xd8   :  { %604 = vset.pattern.permute.xlu1 %v664_v23 }
  0xd9   :  { %421 = vperm.xlu1 %604, %v193_v31  }
  0xdf   :  { %605 = vset.pattern.permute.xlu0 %v664_v23 }
  0xe4   :  { %460 = vmatmul.msk.bf16.gmra.mxu0 %vm254_vm0, %v450_v39  ;;  %462 = vmatmul.msk.bf16.gmra.mxu3 %vm254_vm0, %v458_v40 }
 0x151   :  { %v276_v41 = vpop.f32.mrf.mxu0 }
 0x152   :  { %v277_v6 = vadd.f32 %v276_v41, %v197_v2 }
 0x154   :  { %v296_v11 = vmax.f32 %v277_v6, 0.0 }
 0x157   :  { %v286_v44 = vpop.f32.mrf.mxu3 }
 0x158   :  { %v287_v59 = vadd.f32 %v286_v44, %v217_v42  ;;  %v476_v44 = vor.u32 %v484_v34, %v475_v25 }
 0x159   :  { %v278_v45 = vpop.f32.mrf.mxu0 }
 0x15a   :  { %v300_v3 = vmax.f32 %v287_v59, 0.0  ;;  %v279_v5 = vadd.f32 %v278_v45, %v202_v1  ;;  %v371_v45 = vpop.permute.xlu1 %370 }
 0x15c   :  { %v297_v10 = vmax.f32 %v279_v5, 0.0 }
 0x15e   :  { %v304_v15 = vpack.c.bf16 %v297_v10, %v296_v11 }
 0x15f   :  { %v288_v46 = vpop.f32.mrf.mxu3 }
 0x160   :  { %v289_v56 = vadd.f32 %v288_v46, %v222_v48 }
 0x161   :  { %v281_v50 = vpop.f32.mrf.mxu0 }
 0x162   :  { %v301_v62 = vmax.f32 %v289_v56, 0.0  ;;  %v282_v4 = vadd.f32 %v281_v50, %v207_v53 }
 0x164   :  { %v306_v8 = vpack.c.bf16 %v301_v62, %v300_v3  ;;  %v298_v9 = vmax.f32 %v282_v4, 0.0 }
 0x167   :  { %v291_v51 = vpop.f32.mrf.mxu3 }
 0x168   :  { %v292_v54 = vadd.f32 %v291_v51, %v227_v43 }
 0x169   :  { %v283_v58 = vpop.f32.mrf.mxu0 }
 0x16a   :  { %v302_v60 = vmax.f32 %v292_v54, 0.0  ;;  %v284_v63 = vadd.f32 %v283_v58, %v212_v52  ;;  %v404_v52 = vpop.permute.xlu1 %403 }
 0x16c   :  { %v299_v7 = vmax.f32 %v284_v63, 0.0 }
 0x16e   :  { %v305_v12 = vpack.c.bf16 %v299_v7, %v298_v9 }
 0x16f   :  { %v293_v55 = vpop.f32.mrf.mxu3 }
 0x170   :  { %v294_v57 = vadd.f32 %v293_v55, %v232_v47  ;;  %v375_v47 = vpop.permute.xlu2 %374 }
 0x172   :  { %v303_v61 = vmax.f32 %v294_v57, 0.0  ;;  %v422_v63 = vpop.permute.xlu1 %421 }
 0x174   :  { %v307_v0 = vpack.c.bf16 %v303_v61, %v302_v60 }
 0x176   :  { %348 = vmatpush.bf16.msra.mxu1 %v307_v0 }
 0x178   :  { %v408_v53 = vpop.permute.xlu2 %407 }
 0x17a   :  { %349 = vmatpush.bf16.msra.mxu1 %v306_v8 }
 0x17e   :  { %350 = vmatpush.bf16.msra.mxu1 %v305_v12 }
 0x182   :  { %351 = vmatpush.bf16.msra.mxu1 %v304_v15 }
 0x185   :  { %471 = vmatmul.msk.bf16.vlgmr.msra.gmra.mxu1 %vm254_vm0, %v466_v16 }
 0x195   :  { %472 = vmatmul.msk.bf16.gmra.mxu1 %vm254_vm0, %v470_v19 }
 0x202   :  { %v353_v20 = vpop.f32.mrf.mxu1 }
 0x203   :  { %v354_v37 = vadd.f32 %v353_v20, %v311_v32 }
 0x205   :  { %v363_v42 = vmax.f32 %v354_v37, 0.0 }
 0x20a   :  { %v355_v22 = vpop.f32.mrf.mxu1 }
 0x20b   :  { %v356_v35 = vadd.f32 %v355_v22, %v316_v29 }
 0x20d   :  { %v364_v40 = vmax.f32 %v356_v35, 0.0 }
 0x20f   :  { %v367_v43 = vpack.c.bf16 %v364_v40, %v363_v42 }
 0x212   :  { %v358_v27 = vpop.f32.mrf.mxu1 }
 0x213   :  { %v359_v30 = vadd.f32 %v358_v27, %v321_v26 }
 0x215   :  { %v365_v38 = vmax.f32 %v359_v30, 0.0 }
 0x21a   :  { %v360_v33 = vpop.f32.mrf.mxu1 }
 0x21b   :  { %v361_v36 = vadd.f32 %v360_v33, %v326_v24 }
 0x21d   :  { %v366_v39 = vmax.f32 %v361_v36, 0.0 }
 0x21f   :  { %v368_v41 = vpack.c.bf16 %v366_v39, %v365_v38 }
 0x221   :  { %392 = vmatpush.bf16.msra.mxu2 %v368_v41 }
 0x225   :  { %393 = vmatpush.bf16.msra.mxu2 %v367_v43 }
 0x228   :  { %477 = vmatmul.msk.bf16.vlgmr.msra.gmra.mxu2 %vm382_vm1, %v476_v44 }
 0x2ab   :  { %v395_v46 = vpop.f32.mrf.mxu2 }
 0x2ac   :  { %v396_v48 = vadd.f32 %v395_v46, %v371_v45 }
 0x2ae   :  { %v400_v50 = vmax.f32 %v396_v48, 0.0 }
 0x2b0   :  { %v410_v55 = vmul.f32 %v404_v52, %v400_v50 }
 0x2b3   :  { %v397_v49 = vpop.f32.mrf.mxu2 }
 0x2b4   :  { %v398_v51 = vadd.f32 %v397_v49, %v375_v47 }
 0x2b6   :  { %v401_v54 = vmax.f32 %v398_v51, 0.0 }
 0x2b8   :  { %v411_v56 = vmul.f32 %v408_v53, %v401_v54 }
 0x2ba   :  { %v412_v57 = vadd.f32 %v411_v56, %v410_v55 }
 0x2bc   :  { %v413_v58 = vrot.slane %v412_v57, 4 }
 0x2be   :  { %v414_v59 = vadd.f32 %v413_v58, %v412_v57 }
 0x2c0   :  { %v415_v60 = vrot.slane %v414_v59, 2 }
 0x2c2   :  { %v416_v61 = vadd.f32 %v415_v60, %v414_v59 }
 0x2c4   :  { %v417_v62 = vrot.slane %v416_v61, 1 }
 0x2c6   :  { %v418_v0 = vadd.f32 %v417_v62, %v416_v61 }
 0x2c8   :  { %v424_v1 = vadd.f32 %v422_v63, %v418_v0 }
 0x2ca   :  { %425 = vst [vmem:[#allocation5] sm:$0x1] %v424_v1 }
 0x2cb   :  { %436 = dma.vmem_to_hbm [thread:$0]  %s432_s26, 16, %s434_s1, [#allocation4]  }
 0x2cc   :  { %656 = dma.done.wait [#allocation4], 16  }
 0x2cd   :  { %657 = vsyncadd [#allocation4], 4294967280 }
 0x2ce   :  { %441 = vsyncpa [#allocation3], 1 }
 0x2cf   :  { %442 = vsyncpa [#allocation4], 1 }

</bundles_post_ra>
